<compile_context>
chip_gen: v5e
topology: v5e:2x2
jax: 0.10.0
libtpu: 0.0.40
codegen_flags: <defaults>
</compile_context>

<pallas_src>
import functools

import jax
import jax.numpy as jnp
from jax.experimental import pallas as pl
from jax.experimental.pallas import tpu as pltpu

_MiB = 1024 * 1024


# --------------------------------------------------------------------------------------
# Parameter setup (plain JAX glue)
# --------------------------------------------------------------------------------------
def _spectral_normalize(w2d):
    # TODO(synk): PyTorch uses one-step power iteration; we use the exact largest singular
    # value, which is what power iteration converges to.
    sigma = jnp.linalg.svd(w2d, compute_uv=False)[0]
    return w2d / sigma


def _pick_hw_tile(hw, cap):
    """Spatial tile: whole extent if small, else a 128-multiple divisor of HW."""
    if hw <= cap:
        return hw
    for t in (4096, 3072, 2048, 1536, 1024, 768, 512, 384, 256, 128):
        if t <= cap and hw % t == 0:
            return t
    return hw  # irregular spatial size: fall back to the full extent


# --------------------------------------------------------------------------------------
# Kernels
# --------------------------------------------------------------------------------------
def snse_fused_kernel(x_ref, w1_ref, b1_ref, w2_ref, b2_ref, o_ref, *, inv_hw):
    # x_ref/o_ref: (C, HW)   w1_ref: (Cr, C)  b1_ref: (Cr, 1)  w2_ref: (C, Cr)  b2_ref: (C, 1)
    xf = x_ref[...]
    # Global average pool: lane reduce, accumulated in f32.
    pooled = jnp.sum(xf.astype(jnp.float32), axis=-1, keepdims=True) * inv_hw   # (C, 1)
    # conv1 (1x1) == matvec, ReLU
    h = jnp.dot(w1_ref[...], pooled, preferred_element_type=jnp.float32) + b1_ref[...]
    h = jnp.maximum(h, 0.0)                                                      # (Cr, 1)
    # conv2 (1x1) == matvec, sigmoid
    s = jnp.dot(w2_ref[...], h, preferred_element_type=jnp.float32) + b2_ref[...]
    g = jax.nn.sigmoid(s)                                                        # (C, 1)
    # Per-channel gate broadcast over the lane (spatial) axis, multiply in input dtype.
    o_ref[...] = xf * g.astype(o_ref.dtype)


def pool_gate_kernel(x_ref, w1_ref, b1_ref, w2_ref, b2_ref, g_ref, acc_ref, *, inv_hw):
    # x_ref : (C, THW)    w1_ref: (Cr, C)   b1_ref: (Cr, 1)
    # w2_ref: (C, Cr)     b2_ref: (C, 1)
    # g_ref : (C, 1) out  acc_ref: (C, 1) f32 scratch, persists across the HW-tile axis
    t = pl.program_id(1)

    @pl.when(t == 0)
    def _():
        acc_ref[...] = jnp.zeros_like(acc_ref)

    # Partial global-average-pool: lane reduce over this spatial tile, accumulated in f32.
    acc_ref[...] += jnp.sum(x_ref[...].astype(jnp.float32), axis=-1, keepdims=True)

    @pl.when(t == pl.num_programs(1) - 1)
    def _():
        pooled = acc_ref[...] * inv_hw                                           # (C, 1)
        h = jnp.dot(w1_ref[...], pooled, preferred_element_type=jnp.float32) + b1_ref[...]
        h = jnp.maximum(h, 0.0)                                                  # (Cr, 1)
        s = jnp.dot(w2_ref[...], h, preferred_element_type=jnp.float32) + b2_ref[...]
        g_ref[...] = jax.nn.sigmoid(s)                                           # (C, 1)


def scale_kernel(x_ref, g_ref, o_ref):
    # x_ref / o_ref: (C, THW)   g_ref: (C, 1)
    o_ref[...] = x_ref[...] * g_ref[...].astype(o_ref.dtype)


# --------------------------------------------------------------------------------------
# Wrapper
# --------------------------------------------------------------------------------------
def snse_block(x_nchw, w1, b1, w2, b2, *,
               single_pass_max_bytes=6 * _MiB, hw_tile_cap=2048):
    """x_nchw: (B, C, H, W).  w1: (Cr, C), b1: (Cr,), w2: (C, Cr), b2: (C,)."""
    B, C, H, W = x_nchw.shape
    Cr = w1.shape[0]
    HW = H * W

    # Spectral norm of the 1x1 conv weights viewed as (out, in) matrices.
    w1n = _spectral_normalize(w1)          # (Cr, C)
    w2n = _spectral_normalize(w2)          # (C, Cr)
    b1c = b1.reshape(Cr, 1)
    b2c = b2.reshape(C, 1)

    # NCHW -> (B, C, HW): contiguous reshape, no transpose; HW on the lane axis.
    x = x_nchw.reshape(B, C, HW)
    itemsize = x.dtype.itemsize
    blk_full = C * HW * itemsize

    # ---------------- Fused single-pass path ----------------
    if blk_full <= single_pass_max_bytes:
        # Budget: double-buffered in + out blocks + the transient f32 copy + weights.
        vmem_limit = int(min(50 * _MiB,
                             max(32 * _MiB, 4 * blk_full + C * HW * 4 + 2 * _MiB)))
        out = pl.pallas_call(
            functools.partial(snse_fused_kernel, inv_hw=1.0 / HW),
            out_shape=jax.ShapeDtypeStruct((B, C, HW), x.dtype),
            grid=(B,),
            in_specs=[
                pl.BlockSpec((None, C, HW), lambda b: (b, 0, 0)),
                pl.BlockSpec((Cr, C), lambda b: (0, 0)),
                pl.BlockSpec((Cr, 1), lambda b: (0, 0)),
                pl.BlockSpec((C, Cr), lambda b: (0, 0)),
                pl.BlockSpec((C, 1), lambda b: (0, 0)),
            ],
            out_specs=pl.BlockSpec((None, C, HW), lambda b: (b, 0, 0)),
            compiler_params=pltpu.CompilerParams(
                dimension_semantics=("parallel",),
                vmem_limit_bytes=vmem_limit,
            ),
        )(x, w1n, b1c, w2n, b2c)
        return out.reshape(B, C, H, W)

    # ---------------- Tiled two-pass path ----------------
    thw = _pick_hw_tile(HW, hw_tile_cap)
    if HW % thw != 0:
        thw = HW
    n_t = HW // thw
    blk = C * thw * itemsize
    vmem_limit = int(min(50 * _MiB, max(32 * _MiB, 5 * blk + 2 * _MiB)))

    # Pass 1: global average pool (tiled, f32 accumulator) + squeeze/excite gate.
    gate = pl.pallas_call(
        functools.partial(pool_gate_kernel, inv_hw=1.0 / HW),
        out_shape=jax.ShapeDtypeStruct((B, C, 1), jnp.float32),
        grid_spec=pltpu.PrefetchScalarGridSpec(
            num_scalar_prefetch=0,
            grid=(B, n_t),
            in_specs=[
                pl.BlockSpec((None, C, thw), lambda b, t: (b, 0, t)),
                pl.BlockSpec((Cr, C), lambda b, t: (0, 0)),
                pl.BlockSpec((Cr, 1), lambda b, t: (0, 0)),
                pl.BlockSpec((C, Cr), lambda b, t: (0, 0)),
                pl.BlockSpec((C, 1), lambda b, t: (0, 0)),
            ],
            out_specs=pl.BlockSpec((None, C, 1), lambda b, t: (b, 0, 0)),
            scratch_shapes=[pltpu.VMEM((C, 1), jnp.float32)],
        ),
        compiler_params=pltpu.CompilerParams(
            dimension_semantics=("parallel", "arbitrary"),
            vmem_limit_bytes=vmem_limit,
        ),
    )(x, w1n, b1c, w2n, b2c)

    # Pass 2: broadcast multiply, fully parallel (B, HW_tiles) grid, lane-dense stores.
    out = pl.pallas_call(
        scale_kernel,
        out_shape=jax.ShapeDtypeStruct((B, C, HW), x.dtype),
        grid=(B, n_t),
        in_specs=[
            pl.BlockSpec((None, C, thw), lambda b, t: (b, 0, t)),
            pl.BlockSpec((None, C, 1), lambda b, t: (b, 0, 0)),
        ],
        out_specs=pl.BlockSpec((None, C, thw), lambda b, t: (b, 0, t)),
        compiler_params=pltpu.CompilerParams(
            dimension_semantics=("parallel", "parallel"),
            vmem_limit_bytes=vmem_limit,
        ),
    )(x, gate)

    return out.reshape(B, C, H, W)


# --------------------------------------------------------------------------------------
# Pure-JAX reference
# --------------------------------------------------------------------------------------
def snse_reference(x_nchw, w1, b1, w2, b2):
    w1n = _spectral_normalize(w1)
    w2n = _spectral_normalize(w2)
    z = jnp.mean(x_nchw, axis=(2, 3))                 # (B, C)
    z = jnp.maximum(z @ w1n.T + b1, 0.0)              # (B, Cr)
    z = jax.nn.sigmoid(z @ w2n.T + b2)                # (B, C)
    return x_nchw * z[:, :, None, None]


if __name__ == "__main__":
    def run_case(B, C, H, W, reduction, **kw):
        Cr = C // reduction
        key = jax.random.PRNGKey(0)
        kx, k1, kb1, k2, kb2 = jax.random.split(key, 5)
        x = jax.random.normal(kx, (B, C, H, W), dtype=jnp.float32)
        w1 = jax.random.normal(k1, (Cr, C), dtype=jnp.float32) * 0.2   # conv1 weight (1x1)
        b1 = jax.random.normal(kb1, (Cr,), dtype=jnp.float32) * 0.1
        w2 = jax.random.normal(k2, (C, Cr), dtype=jnp.float32) * 0.2   # conv2 weight (1x1)
        b2 = jax.random.normal(kb2, (C,), dtype=jnp.float32) * 0.1

        out = jax.block_until_ready(snse_block(x, w1, b1, w2, b2, **kw))
        ref = snse_reference(x, w1, b1, w2, b2)
        assert out.shape == x.shape and out.dtype == x.dtype
        assert jnp.allclose(out, ref, rtol=1e-5, atol=1e-5), "mismatch vs reference"

    # Fused single-pass path (whole (C, HW) slab per batch item fits in VMEM).
    run_case(2, 32, 16, 16, 8)
    # Tiled two-pass fallback (forced): 2 spatial tiles exercise the f32 pool accumulator.
    run_case(1, 16, 32, 32, 8, single_pass_max_bytes=0, hw_tile_cap=512)

    print("KERNEL_OK")
</pallas_src>

<mosaic_0001>
module attributes {stable_mosaic.version = 11 : i64} {
  func.func @snse_fused_kernel(%arg0: i32, %arg1: memref<1x32x256xf32, #tpu.memory_space<vmem>>, %arg2: memref<4x32xf32, #tpu.memory_space<vmem>>, %arg3: memref<4x1xf32, #tpu.memory_space<vmem>>, %arg4: memref<32x4xf32, #tpu.memory_space<vmem>>, %arg5: memref<32x1xf32, #tpu.memory_space<vmem>>, %arg6: memref<1x32x256xf32, #tpu.memory_space<vmem>>) attributes {dimension_semantics = [#tpu.dimension_semantics<parallel>], iteration_bounds = array<i64: 2>, scalar_prefetch = 0 : i64, scratch_operands = 0 : i64, tpu.core_type = #tpu.core_type<tc>, window_params = [{transform_indices = @transform_0, window_bounds = array<i64: 1, 32, 256>}, {pipeline_mode = #tpu.pipeline_mode<synchronous>, transform_indices = @transform_1, window_bounds = array<i64: 4, 32>}, {pipeline_mode = #tpu.pipeline_mode<synchronous>, transform_indices = @transform_2, window_bounds = array<i64: 4, 1>}, {pipeline_mode = #tpu.pipeline_mode<synchronous>, transform_indices = @transform_3, window_bounds = array<i64: 32, 4>}, {pipeline_mode = #tpu.pipeline_mode<synchronous>, transform_indices = @transform_4, window_bounds = array<i64: 32, 1>}, {transform_indices = @transform_5, window_bounds = array<i64: 1, 32, 256>}]} {
    %c0 = arith.constant 0 : index
    %c0_0 = arith.constant 0 : index
    %c0_1 = arith.constant 0 : index
    %0 = vector.load %arg1[%c0, %c0_0, %c0_1] : memref<1x32x256xf32, #tpu.memory_space<vmem>>, vector<1x32x256xf32>
    %1 = vector.shape_cast %0 : vector<1x32x256xf32> to vector<32x256xf32>
    %cst = arith.constant dense<0.000000e+00> : vector<32xf32>
    %2 = vector.multi_reduction <add>, %1, %cst [1] : vector<32x256xf32> to vector<32xf32>
    %3 = vector.shape_cast %2 : vector<32xf32> to vector<32x1xf32>
    %cst_2 = arith.constant 3.906250e-03 : f32
    %4 = vector.broadcast %cst_2 : f32 to vector<32x1xf32>
    %5 = arith.mulf %3, %4 : vector<32x1xf32>
    %c0_3 = arith.constant 0 : index
    %c0_4 = arith.constant 0 : index
    %6 = vector.load %arg2[%c0_3, %c0_4] : memref<4x32xf32, #tpu.memory_space<vmem>>, vector<4x32xf32>
    %cst_5 = arith.constant dense<0.000000e+00> : vector<4x1xf32>
    %7 = tpu.matmul %6, %5, %cst_5 {dimension_numbers = #tpu.dot_dimension_numbers<[1], [0], [0], [1], [0, 0, 1, 1], [], []>} : vector<4x32xf32>, vector<32x1xf32>, vector<4x1xf32> -> vector<4x1xf32>
    %c0_6 = arith.constant 0 : index
    %c0_7 = arith.constant 0 : index
    %8 = vector.load %arg3[%c0_6, %c0_7] : memref<4x1xf32, #tpu.memory_space<vmem>>, vector<4x1xf32>
    %9 = arith.addf %7, %8 : vector<4x1xf32>
    %cst_8 = arith.constant 0.000000e+00 : f32
    %10 = vector.broadcast %cst_8 : f32 to vector<4x1xf32>
    %11 = arith.maximumf %9, %10 : vector<4x1xf32>
    %c0_9 = arith.constant 0 : index
    %c0_10 = arith.constant 0 : index
    %12 = vector.load %arg4[%c0_9, %c0_10] : memref<32x4xf32, #tpu.memory_space<vmem>>, vector<32x4xf32>
    %cst_11 = arith.constant dense<0.000000e+00> : vector<32x1xf32>
    %13 = tpu.matmul %12, %11, %cst_11 {dimension_numbers = #tpu.dot_dimension_numbers<[1], [0], [0], [1], [0, 0, 1, 1], [], []>} : vector<32x4xf32>, vector<4x1xf32>, vector<32x1xf32> -> vector<32x1xf32>
    %c0_12 = arith.constant 0 : index
    %c0_13 = arith.constant 0 : index
    %14 = vector.load %arg5[%c0_12, %c0_13] : memref<32x1xf32, #tpu.memory_space<vmem>>, vector<32x1xf32>
    %15 = arith.addf %13, %14 : vector<32x1xf32>
    %16 = arith.negf %15 : vector<32x1xf32>
    %17 = math.exp %16 : vector<32x1xf32>
    %cst_14 = arith.constant 1.000000e+00 : f32
    %18 = vector.broadcast %cst_14 : f32 to vector<32x1xf32>
    %19 = arith.addf %18, %17 : vector<32x1xf32>
    %20 = arith.divf %18, %19 : vector<32x1xf32>
    %21 = vector.broadcast %20 : vector<32x1xf32> to vector<32x256xf32>
    %22 = arith.mulf %1, %21 : vector<32x256xf32>
    %c0_15 = arith.constant 0 : index
    %c0_16 = arith.constant 0 : index
    %c0_17 = arith.constant 0 : index
    %23 = vector.load %arg6[%c0_15, %c0_16, %c0_17] : memref<1x32x256xf32, #tpu.memory_space<vmem>>, vector<1x32x256xf32>
    %24 = vector.shape_cast %23 : vector<1x32x256xf32> to vector<32x256xf32>
    %25 = vector.shape_cast %22 : vector<32x256xf32> to vector<1x32x256xf32>
    tpu.vector_store %arg6[%c0_15, %c0_16, %c0_17], %25 {strides = array<i32>} : memref<1x32x256xf32, #tpu.memory_space<vmem>>, vector<1x32x256xf32>,
    return
  }
  func.func @transform_0(%arg0: i32) -> (i32, i32, i32) {
    %c0_i32 = arith.constant 0 : i32
    %c0_i32_0 = arith.constant 0 : i32
    %c0_i32_1 = arith.constant 0 : i32
    return %arg0, %c0_i32, %c0_i32_0 : i32, i32, i32
  }
  func.func @transform_1(%arg0: i32) -> (i32, i32) {
    %c0_i32 = arith.constant 0 : i32
    %c0_i32_0 = arith.constant 0 : i32
    %c0_i32_1 = arith.constant 0 : i32
    return %c0_i32, %c0_i32_0 : i32, i32
  }
  func.func @transform_2(%arg0: i32) -> (i32, i32) {
    %c0_i32 = arith.constant 0 : i32
    %c0_i32_0 = arith.constant 0 : i32
    %c0_i32_1 = arith.constant 0 : i32
    return %c0_i32, %c0_i32_0 : i32, i32
  }
  func.func @transform_3(%arg0: i32) -> (i32, i32) {
    %c0_i32 = arith.constant 0 : i32
    %c0_i32_0 = arith.constant 0 : i32
    %c0_i32_1 = arith.constant 0 : i32
    return %c0_i32, %c0_i32_0 : i32, i32
  }
  func.func @transform_4(%arg0: i32) -> (i32, i32) {
    %c0_i32 = arith.constant 0 : i32
    %c0_i32_0 = arith.constant 0 : i32
    %c0_i32_1 = arith.constant 0 : i32
    return %c0_i32, %c0_i32_0 : i32, i32
  }
  func.func @transform_5(%arg0: i32) -> (i32, i32, i32) {
    %c0_i32 = arith.constant 0 : i32
    %c0_i32_0 = arith.constant 0 : i32
    %c0_i32_1 = arith.constant 0 : i32
    return %arg0, %c0_i32, %c0_i32_0 : i32, i32, i32
  }
}

</mosaic_0001>

<bundles_post_ra>
// kernel: tpu_custom_call.1
= control target key start
LH: loop header
LB: loop body
LE: loop exit
PB: predicated region body
PF: predicated region fallthrough
CT: control target
= control target key end

     0   :  { %10 = vsyncpa [#allocation3], 0  ;;  %s975_s0 = inlined_call_operand.hbm [shape: f32[2,32,256], index: 0, kind: input, shape index: {}]   ;;  %s976_s1 = inlined_call_operand.vmem [shape: f32[4,32], index: 1, kind: input, shape index: {}]   ;;  %s977_s2 = inlined_call_operand.vmem [shape: f32[4,1], index: 2, kind: input, shape index: {}]   ;;  %s978_s3 = inlined_call_operand.vmem [shape: f32[32,4], index: 3, kind: input, shape index: {}]   ;;  %s979_s4 = inlined_call_operand.vmem [shape: f32[32,1], index: 4, kind: input, shape index: {}]   ;;  %s980_s5 = inlined_call_operand.hbm [shape: f32[2,32,256], index: 5, kind: output, shape index: {}]  }
   0x1   :  { %12 = vsyncpa [#allocation3 + $0x1], 0 }
   0x2   :  { %13 = vsyncpa [#allocation4], 0 }
   0x3   :  { %15 = vsyncpa [#allocation4 + $0x1], 0  ;;  %s782_s18 = smov 0   ;;  %s784_s19 = smov 0  }
   0x4   :  { %s786_s20 = smov 0   ;;  %s788_s21 = smov 0  }
   0x5 LB: > { %s803_s22 = sadd.s32 4294967295, %s745_s21   ;;  %s551_s23 = sadd.s32 4294967294, %s745_s21   ;;  %s745_s21 = sphi %s788_s21, %s990_s21   ;;  %s741_s20 = sphi %s786_s20, %s989_s20   ;;  %s737_s19 = sphi %s784_s19, %s988_s19   ;;  %s733_s18 = sphi %s782_s18, %s987_s18  }
   0x6   : > { %s807_s24 = sadd.s32 1, %s745_s21   ;;  %s28_s25 = sadd.s32 1, %s741_s20 }
   0x7   : > { %s25_s26 = ssub.s32 %s745_s21, %s807_s24  ;;  %p35_p0 = scmp.ne.s32.totalorder %s741_s20, %s737_s19 }
   0x8   : > { %p26_p1 = scmp.eq.s32.totalorder %s25_s26, 0  ;;  %p36_p2 = scmp.eq.s32.totalorder %s745_s21, 0 }
   0x9   : > { %p41_p3 = scmp.ne.s32.totalorder %s737_s19, %s733_s18  ;;  %p42_p4 = scmp.eq.s32.totalorder %s803_s22, 0 }
   0xa   : > { %s819_s27 = scalar_select %p26_p1, %s741_s20, %s28_s25  }
   0xb   : > { %p821_p5 = por %p36_p2, %p35_p0  ;;  %p825_p6 = por %p42_p4, %p41_p3 }
   0xc   : > { %p149_p7 = scmp.eq.s32.totalorder %s803_s22, 1  ;;  %p155_p8 = scmp.eq.s32.totalorder %s551_s23, 1 }
   0xd   : > { %p591_p10 = scmp.lt.s32.totalorder %s745_s21, 2  ;;  %s187_s7 = sand.u32 1, %s741_s20  }
   0xe   : > { %p832_p11 = por %p149_p7, %p35_p0  ;;  %p836_p12 = por %p155_p8, %p41_p3 }
   0xf   : > { %s575_s8 = sshll.u32 %s745_s21, 6  ;;  %s554_s9 = sshll.u32 %s187_s7, 6 }
  0x10   : > { %s196_s12 = scalar_lea.hbm %s975_s0, %s575_s8  ;;  %s191_s14 = scalar_lea.vmem [#allocation2], %s554_s9 }
  0x11   : > { %s197_s13 = sshll.u32 %s196_s12, 4  ;;  %s199_s15 = sshll.u32 %s191_s14, 4  ;;  %s198_s13 = int_to_ptr.hbm [resolvable:$true] %s197_s13  ;;  %s200_s15 = int_to_ptr.vmem [resolvable:$true] %s199_s15 }
  0x12   : > { %p847_p13 = pnand %p591_p10, %p821_p5  ;;  %p557_p0 = scmp.ge.s32.totalorder %s745_s21, 1 }
  0x13   : > { %p207_p1 = scmp.lt.s32.totalorder %s745_s21, 3  ;;  %s188_s17 = scalar_lea.sflag [#allocation3], %s187_s7 }
  0x14   : > { %s649_s23 = sshra.s32 %s198_s13, 4  ;;  %p653_p3 = pneg %p847_p13  ;;  %s650_s23 = int_to_ptr.hbm [resolvable:$true] %s649_s23 }
  0x15   : > { %s651_s25 = scalar_lea.hbm %s650_s23, 64  ;;  %s656_s28 = scalar_lea.hbm %s975_s0, 128 }
  0x16   : > { %p652_p2 = scmp.ne.s32.totalorder %s650_s23, %s651_s25  ;;  %p657_p5 = scmp.lt.s32.totalorder %s650_s23, %s975_s0 }
  0x17   : > { %p658_p8 = scmp.lt.s32.totalorder %s656_s28, %s651_s25 }
  0x18   : > { %p654_p4 = pnand %p653_p3, %p652_p2 }
  0x19   : > { %p659_p10 = por %p658_p8, %p657_p5 }
  0x1a   : > { %p655_p7 = pneg %p654_p4 }
  0x1c   : > { %p660_p9 = pnand %p659_p10, %p655_p7 }
  0x1e   : > { %663 = shalt.err (!%p660_p9)
}
  0x1f   : > { %s747_s7 = smov 256   ;;  %s748_s11 = smov 16  }
  0x20   : > { %586 = dma.hbm_to_vmem [thread:$0]  (!%p847_p13), %s198_s13, 1024, %s200_s15, %s188_s17, %s747_s7, %s747_s7, %s748_s11  }
  0x21   : > { %p208_p2 = pnand %p557_p0, %p207_p1 }
  0x22   : > { %s868_s12 = sand.u32 (!%p208_p2), 1, %s737_s19  }
  0x23   : > { %211 = sbr.rel (%p208_p2) target bundleno = 599 (0x257), region = 40  ;;  %s558_s14 = sshll.u32 (!%p208_p2), %s868_s12, 6 }
  0x24   : > { %s214_s23 = scalar_lea.sflag (!%p208_p2), [#allocation3], %s868_s12  ;;  %s217_s25 = scalar_lea.vmem (!%p208_p2), [#allocation2], %s558_s14 }
  0x28   : > { %724 = dma.done.wait (%p825_p6), %s214_s23, 1024  }
  0x29   : > { %726 = vsyncadd (%p825_p6), %s214_s23, 4294966272  ;;  %v878_v0 = vld [vmem:[%s217_s25 + $0x30] sm:$0xff]  ;;  %v880_v1 = vld [vmem:[%s217_s25 + $0x38] sm:$0xff]  ;;  %vm271_vm0 = vcmask 261120   ;;  %vm317_vm1 = vcmask 1043456   ;;  %vm304_vm2 = vcmask 31744  }
  0x2a   : > { %v882_v2 = vld [vmem:[%s217_s25 + $0x10] sm:$0xff]  ;;  %v262_v3 = vadd.f32 %v880_v1, %v878_v0  ;;  %v886_v4 = vld [vmem:[%s217_s25 + $0x18] sm:$0xff]  ;;  %v890_v6 = vld [vmem:[%s217_s25 + $0x20] sm:$0xff]  ;;  %v749_v30 = vmov 0   ;;  %s244_s8 = scalar_lea.vmem [#allocation5], %s558_s14  ;;  %s576_s28 = sshll.u32 %s803_s22, 6 }
  0x2b   : > { %v256_v5 = vadd.f32 %v886_v4, %v882_v2  ;;  %v892_v7 = vld [vmem:[%s217_s25 + $0x28] sm:$0xff]  ;;  %v894_v8 = vld [vmem:[%s217_s25] sm:$0xff]  ;;  %v299_v27 = vld [vmem:[%s978_s3 + $0x18] sm:$0xff]  ;;  %630 = vset.pattern.permute.xlu2 %v749_v30  ;;  %632 = vset.pattern.permute.xlu1 %v749_v30  ;;  %s474_s14 = scalar_lea.hbm %s980_s5, %s576_s28  ;;  %s475_s7 = sshll.u32 %s244_s8, 4  ;;  %s476_s7 = int_to_ptr.vmem [resolvable:$true] %s475_s7 }
  0x2c   : > { %263 = vadd.xlane.f32.xlu0 %v262_v3  ;;  %v896_v9 = vld [vmem:[%s217_s25 + $0x8] sm:$0xff]  ;;  %v259_v10 = vadd.f32 %v892_v7, %v890_v6  ;;  %v269_v20 = vld [vmem:[%s976_s1] sm:$0xf]  ;;  %v298_v28 = vld [vmem:[%s978_s3 + $0x10] sm:$0xff]  ;;  %s477_s11 = sshll.u32 %s474_s14, 4  ;;  %s463_s22 = scalar_lea.sflag [#allocation4], %s868_s12  ;;  %s478_s11 = int_to_ptr.hbm [resolvable:$true] %s477_s11 }
  0x2d   : > { %257 = vadd.xlane.f32.xlu1 %v256_v5  ;;  %v253_v11 = vadd.f32 %v896_v9, %v894_v8  ;;  %v270_v21 = vld [vmem:[%s977_s2] sm:$0xf]  ;;  %v297_v26 = vld [vmem:[%s978_s3 + $0x8] sm:$0xff]  ;;  %631 = vset.pattern.permute.xlu0 %v749_v30  ;;  %v303_v35 = vld [vmem:[%s979_s4 + $0x18] sm:$0xff]  ;;  %s693_s23 = sshra.s32 %s478_s11, 4  ;;  %s699_s15 = scalar_lea.hbm %s980_s5, 128  ;;  %s694_s23 = int_to_ptr.hbm [resolvable:$true] %s693_s23 }
  0x2e   : > { %v296_v25 = vld [vmem:[%s978_s3] sm:$0xff]  ;;  %v301_v34 = vld [vmem:[%s979_s4 + $0x8] sm:$0xff]  ;;  %v302_v44 = vld [vmem:[%s979_s4 + $0x10] sm:$0xff]  ;;  %s695_s25 = scalar_lea.hbm %s694_s23, 64  ;;  %p700_p0 = scmp.lt.s32.totalorder %s694_s23, %s980_s5 }
  0x2f   : > { %v300_v29 = vld [vmem:[%s979_s4] sm:$0xff]  ;;  %p696_p6 = scmp.ne.s32.totalorder %s694_s23, %s695_s25  ;;  %p701_p1 = scmp.lt.s32.totalorder %s699_s15, %s695_s25 }
  0x31   : > { %p697_p9 = pnand %p696_p6, %p832_p11  ;;  %p702_p3 = por %p701_p1, %p700_p0 }
  0x33   : > { %p698_p13 = pneg %p697_p9 }
  0x34   : > { %260 = vadd.xlane.f32.xlu0 %v259_v10 }
  0x35   : > { %254 = vadd.xlane.f32.xlu1 %v253_v11  ;;  %p703_p4 = pnand %p702_p3, %p698_p13 }
  0x9f   : > { %v264_v12 = vpop.xlane.xlu0 %263 }
  0xa0   : > { %v268_v13 = vmul.f32 0.00390625, %v264_v12  ;;  %v258_v14 = vpop.xlane.xlu1 %257 }
  0xa1   : > { %v266_v18 = vmul.f32 0.00390625, %v258_v14 }
  0xa2   : > { %287 = vmatpush.msra.mxu0 %v268_v13 }
  0xa7   : > { %v261_v15 = vpop.xlane.xlu0 %260 }
  0xa8   : > { %v267_v16 = vmul.f32 0.00390625, %v261_v15  ;;  %v255_v17 = vpop.xlane.xlu1 %254 }
  0xa9   : > { %v265_v19 = vmul.f32 0.00390625, %v255_v17 }
  0xaa   : > { %288 = vmatpush.msra.mxu0 %v267_v16 }
  0xac   : > { %289 = vmatpush.msra.mxu0 %v266_v18 }
  0xae   : > { %290 = vmatpush.msra.mxu0 %v265_v19 }
  0xaf   : > { %560 = vmatmul.msk.f32.vlgmr.msra.gmra.mxu0 %vm271_vm0, %v269_v20 }
 0x12c   : > { %v292_v22 = vpop.f32.mrf.mxu0 }
 0x12d   : > { %v293_v23 = vadd.f32 %v292_v22, %v270_v21 }
 0x12f   : > { %v295_v24 = vmax.f32 %v293_v23, 0.0 }
 0x131   : > { %561 = vmatpush.msk.msra.mxu1 %vm317_vm1, %v295_v24  ;;  %577 = vmatpush.msk.msra.mxu2 %vm317_vm1, %v295_v24 }
 0x132   : > { %578 = vmatpush.msk.msra.mxu3 %vm317_vm1, %v295_v24  ;;  %562 = vmatmul.msk.f32.vlgmr.msra.gmra.mxu1 %vm304_vm2, %v296_v25 }
 0x133   : > { %563 = vmatmul.msk.f32.vlgmr.msra.gmra.mxu2 %vm304_vm2, %v297_v26  ;;  %565 = vmatmul.msk.f32.vlgmr.msra.gmra.mxu3 %vm304_vm2, %v299_v27 }
 0x13b   : > { %564 = vmatmul.msk.f32.gmra.mxu2 %vm304_vm2, %v298_v28 }
 0x1af   : > { %v338_v31 = vpop.f32.mrf.mxu1 }
 0x1b0   : > { %v339_v32 = vadd.f32 %v338_v31, %v300_v29 }
 0x1b2   : > { %v566_v33 = vmul.f32 -1.442695, %v339_v32 }
 0x1b4   : > { %633 = vpow2.f32 %v566_v33 }
 0x1b6   : > { %v341_v36 = vpop.f32.mrf.mxu2  ;;  %v347_v37 = vpop.f32.mrf.mxu3 }
 0x1b7   : > { %v342_v38 = vadd.f32 %v341_v36, %v301_v34  ;;  %v348_v39 = vadd.f32 %v347_v37, %v303_v35 }
 0x1b9   : > { %v567_v40 = vmul.f32 -1.442695, %v342_v38  ;;  %v569_v41 = vmul.f32 -1.442695, %v348_v39 }
 0x1ba   : > { %v634_v42 = vpop.eup %633 }
 0x1bb   : > { %v362_v43 = vadd.f32 1.0, %v634_v42  ;;  %635 = vpow2.f32 %v567_v40 }
 0x1bc   : > { %637 = vpow2.f32 %v569_v41 }
 0x1bd   : > { %639 = vrcp.f32 %v362_v43  ;;  %v377_v54 = vand.u32 2147483648, %v362_v43  ;;  %vm371_vm3 = vweird.f32 %v362_v43  ;;  %v375_v56 = vand.u32 2147483647, %v362_v43 }
 0x1be   : > { %v344_v45 = vpop.f32.mrf.mxu2 }
 0x1bf   : > { %v345_v46 = vadd.f32 %v344_v45, %v302_v44  ;;  %v378_v59 = vor.u32 1.1754944e-38, %v377_v54  ;;  %vm376_vm6 = vcmp.eq.f32.partialorder %v375_v56, 8.507059e+37 }
 0x1c1   : > { %v636_v47 = vpop.eup %635  ;;  %v568_v48 = vmul.f32 -1.442695, %v345_v46 }
 0x1c2   : > { %v638_v49 = vpop.eup %637  ;;  %v363_v50 = vadd.f32 1.0, %v636_v47 }
 0x1c3   : > { %v640_v51 = vpop.eup %639  ;;  %v365_v52 = vadd.f32 1.0, %v638_v49  ;;  %641 = vpow2.f32 %v568_v48 }
 0x1c4   : > { %643 = vrcp.f32 %v363_v50  ;;  %v367_v53 = vmul.f32 %v640_v51, %v362_v43  ;;  %vm372_vm4 = vweird.f32 %v640_v51  ;;  %v392_v16 = vand.u32 2147483648, %v363_v50 }
 0x1c5   : > { %645 = vrcp.f32 %v365_v52  ;;  %vm373_vm5 = vmor %vm371_vm3, %vm372_vm4  ;;  %vm416_vm7 = vweird.f32 %v365_v52  ;;  %v422_v14 = vand.u32 2147483648, %v365_v52  ;;  %v420_v18 = vand.u32 2147483647, %v365_v52 }
 0x1c6   : > { %v368_v55 = vsub.f32 1.0, %v367_v53  ;;  %v390_v19 = vand.u32 2147483647, %v363_v50  ;;  %vm386_vm10 = vweird.f32 %v363_v50  ;;  %v393_v25 = vor.u32 1.1754944e-38, %v392_v16 }
 0x1c7   : > { %v423_v23 = vor.u32 1.1754944e-38, %v422_v14  ;;  %vm421_vm13 = vcmp.eq.f32.partialorder %v420_v18, 8.507059e+37 }
 0x1c8   : > { %v369_v57 = vmul.f32 %v640_v51, %v368_v55  ;;  %vm391_vm14 = vcmp.eq.f32.partialorder %v390_v19, 8.507059e+37 }
 0x1c9   : > { %v642_v58 = vpop.eup %641 }
 0x1ca   : > { %v644_v60 = vpop.eup %643  ;;  %v364_v61 = vadd.f32 1.0, %v642_v58  ;;  %v370_v62 = vadd.f32 %v640_v51, %v369_v57 }
 0x1cb   : > { %v646_v63 = vpop.eup %645  ;;  %v382_v3 = vmul.f32 %v644_v60, %v363_v50  ;;  %vm387_vm8 = vweird.f32 %v644_v60 }
 0x1cc   : > { %647 = vrcp.f32 %v364_v61  ;;  %v374_v5 = vsel %vm373_vm5, %v640_v51, %v370_v62  ;;  %v412_v10 = vmul.f32 %v646_v63, %v365_v52  ;;  %vm417_vm9 = vweird.f32 %v646_v63  ;;  %vm388_vm11 = vmor %vm386_vm10, %vm387_vm8 }
 0x1cd   : > { %v379_v11 = vsel %vm376_vm6, %v378_v59, %v374_v5  ;;  %v383_v12 = vsub.f32 1.0, %v382_v3  ;;  %vm418_vm12 = vmor %vm416_vm7, %vm417_vm9  ;;  %v407_v31 = vand.u32 2147483648, %v364_v61  ;;  %v405_v33 = vand.u32 2147483647, %v364_v61 }
 0x1ce   : > { %428 = vperm.xlu2 %630, %v379_v11   ;;  %v413_v13 = vsub.f32 1.0, %v412_v10  ;;  %vm401_vm0 = vweird.f32 %v364_v61 }
 0x1cf   : > { %v384_v15 = vmul.f32 %v644_v60, %v383_v12  ;;  %v408_v35 = vor.u32 1.1754944e-38, %v407_v31  ;;  %vm406_vm2 = vcmp.eq.f32.partialorder %v405_v33, 8.507059e+37 }
 0x1d0   : > { %v414_v17 = vmul.f32 %v646_v63, %v413_v13 }
 0x1d1   : > { %v385_v20 = vadd.f32 %v644_v60, %v384_v15 }
 0x1d2   : > { %v648_v21 = vpop.eup %647  ;;  %v415_v22 = vadd.f32 %v646_v63, %v414_v17 }
 0x1d3   : > { %v389_v24 = vsel %vm388_vm11, %v644_v60, %v385_v20  ;;  %v397_v26 = vmul.f32 %v648_v21, %v364_v61  ;;  %vm402_vm15 = vweird.f32 %v648_v21 }
 0x1d4   : > { %v419_v27 = vsel %vm418_vm12, %v646_v63, %v415_v22  ;;  %v394_v29 = vsel %vm391_vm14, %v393_v25, %v389_v24  ;;  %vm403_vm1 = vmor %vm401_vm0, %vm402_vm15 }
 0x1d5   : > { %v424_v28 = vsel %vm421_vm13, %v423_v23, %v419_v27  ;;  %v398_v30 = vsub.f32 1.0, %v397_v26 }
 0x1d6   : > { %443 = vperm.xlu1 %632, %v424_v28   ;;  %433 = vperm.xlu2 %630, %v394_v29  }
 0x1d7   : > { %v399_v32 = vmul.f32 %v648_v21, %v398_v30 }
 0x1d9   : > { %v400_v34 = vadd.f32 %v648_v21, %v399_v32 }
 0x1db   : > { %v404_v36 = vsel %vm403_vm1, %v648_v21, %v400_v34 }
 0x1dc   : > { %v409_v37 = vsel %vm406_vm2, %v408_v35, %v404_v36 }
 0x1dd   : > { %438 = vperm.xlu0 %631, %v409_v37  }
 0x228   : > { %v429_v38 = vpop.permute.xlu2 %428 }
 0x229   : > { %v446_v39 = vmul.f32 %v429_v38, %v894_v8  ;;  %v447_v40 = vmul.f32 %v429_v38, %v896_v9 }
 0x22b   : > { %454 = vst [vmem:[%s244_s8] sm:$0xff] %v446_v39 }
 0x22c   : > { %455 = vst [vmem:[%s244_s8 + $0x8] sm:$0xff] %v447_v40 }
 0x230   : > { %v434_v41 = vpop.permute.xlu2 %433 }
 0x231   : > { %v448_v42 = vmul.f32 %v434_v41, %v882_v2  ;;  %v449_v43 = vmul.f32 %v434_v41, %v886_v4 }
 0x233   : > { %456 = vst [vmem:[%s244_s8 + $0x10] sm:$0xff] %v448_v42 }
 0x234   : > { %457 = vst [vmem:[%s244_s8 + $0x18] sm:$0xff] %v449_v43 }
 0x248   : > { %v444_v44 = vpop.permute.xlu1 %443 }
 0x249   : > { %v452_v45 = vmul.f32 %v444_v44, %v878_v0  ;;  %v453_v8 = vmul.f32 %v444_v44, %v880_v1 }
 0x24b   : > { %460 = vst [vmem:[%s244_s8 + $0x30] sm:$0xff] %v452_v45 }
 0x24c   : > { %461 = vst [vmem:[%s244_s8 + $0x38] sm:$0xff] %v453_v8 }
 0x24f   : > { %v439_v2 = vpop.permute.xlu0 %438 }
 0x250   : > { %v450_v4 = vmul.f32 %v439_v2, %v890_v6  ;;  %v451_v9 = vmul.f32 %v439_v2, %v892_v7 }
 0x252   : > { %458 = vst [vmem:[%s244_s8 + $0x20] sm:$0xff] %v450_v4 }
 0x253   : > { %459 = vst [vmem:[%s244_s8 + $0x28] sm:$0xff] %v451_v9 }
 0x254   : > { %706 = shalt.err (!%p703_p4)
}
 0x255   : > { %s750_s12 = smov 256   ;;  %s751_s26 = smov 16  }
 0x256   : > { %581 = dma.vmem_to_hbm [thread:$0]  (%p832_p11), %s476_s7, 1024, %s478_s11, %s463_s22, %s750_s12, %s750_s12, %s751_s26  }
 0x257 PF: > { %s492_s8 = sand.u32 1, %s733_s18   ;;  %p986_p7 = scmp.ge.s32.totalorder %s745_s21, 2 }
 0x258   : > { %s493_s28 = scalar_lea.sflag [#allocation4], %s492_s8 }
 0x259   : > { %p588_p5 = pnand %p986_p7, %p836_p12 }
 0x25b   : > { %p589_p8 = pneg %p588_p5 }
 0x25d   : > { %728 = dma.done.wait (%p589_p8), %s493_s28, 1024  }
 0x25e   : > { %730 = vsyncadd (%p589_p8), %s493_s28, 4294966272  ;;  %p18_p10 = scmp.ge.s32.totalorder %s807_s24, 4   ;;  %s987_s18 = smov %s737_s19 }
 0x25f   : > { %s988_s19 = smov %s741_s20  ;;  %s989_s20 = smov %s819_s27 }
 0x260   : > { %s990_s21 = smov %s807_s24  ;;  %20 = sbr.rel (!%p18_p10) target bundleno = 5 (0x5), region = 85 }
 0x265   :  { %499 = vsyncpa [#allocation3], 1 }
 0x266   :  { %501 = vsyncpa [#allocation3 + $0x1], 1 }
 0x267   :  { %502 = vsyncpa [#allocation4], 1 }
 0x268   :  { %504 = vsyncpa [#allocation4 + $0x1], 1 }

</bundles_post_ra>
